<compile_context>
chip_gen: v7x
topology: tpu7x:2x2x1
jax: 0.10.0
libtpu: 0.0.40
codegen_flags: <defaults>
</compile_context>

<pallas_src>
import jax
import jax.numpy as jnp
from jax.experimental import pallas as pl
from jax.experimental.pallas import tpu as pltpu

NUM_LAYERS = 10
FEAT = 2


def multilinear_kernel(w_ref, b_ref, x_ref, o_ref):
    # w_ref: SMEM (NUM_LAYERS*4,) f32 flattened [out, in] weights
    # b_ref: SMEM (NUM_LAYERS*2,) f32 flattened biases
    # x_ref: VMEM (FEAT, TB)  -- batch on the lane axis
    # o_ref: VMEM (FEAT, TB)
    x0 = x_ref[0:1, :].astype(jnp.float32)   # (1, TB)
    x1 = x_ref[1:2, :].astype(jnp.float32)   # (1, TB)
    # 10 layers is tiny -> fully unroll statically; all scalar weights come
    # from SMEM and broadcast into VPU FMAs (no MXU, no transposes).
    for i in range(NUM_LAYERS):
        w00 = w_ref[4 * i + 0]
        w01 = w_ref[4 * i + 1]
        w10 = w_ref[4 * i + 2]
        w11 = w_ref[4 * i + 3]
        b0 = b_ref[2 * i + 0]
        b1 = b_ref[2 * i + 1]
        y0 = x0 * w00 + x1 * w01 + b0
        y1 = x0 * w10 + x1 * w11 + b1
        x0, x1 = y0, y1
    o_ref[0:1, :] = x0.astype(o_ref.dtype)
    o_ref[1:2, :] = x1.astype(o_ref.dtype)


def multilinear(x, weights, biases, *, tb=512):
    """x: (B, 2), weights: (10, 2, 2) [out, in], biases: (10, 2) -> (B, 2).

    tb: batch tile (lane) width; must be a multiple of 128.
    """
    B, F = x.shape
    assert F == FEAT
    assert tb % 128 == 0

    # Lane-dense layout: batch on the last (lane) axis, padded to the tile.
    B_pad = pl.cdiv(B, tb) * tb
    xt = jnp.zeros((F, B_pad), x.dtype).at[:, :B].set(x.T)

    # Flatten params to 1-D f32 so they sit compactly in SMEM as scalars.
    w_flat = weights.astype(jnp.float32).reshape(-1)   # (40,)
    b_flat = biases.astype(jnp.float32).reshape(-1)    # (20,)

    out_t = pl.pallas_call(
        multilinear_kernel,
        out_shape=jax.ShapeDtypeStruct((F, B_pad), x.dtype),
        grid=(B_pad // tb,),
        in_specs=[
            pl.BlockSpec(memory_space=pltpu.MemorySpace.SMEM),   # weights
            pl.BlockSpec(memory_space=pltpu.MemorySpace.SMEM),   # biases
            pl.BlockSpec((F, tb), lambda i: (0, i)),             # x tile
        ],
        out_specs=pl.BlockSpec((F, tb), lambda i: (0, i)),
        compiler_params=pltpu.CompilerParams(
            dimension_semantics=("parallel",)),
    )(w_flat, b_flat, xt)

    return out_t[:, :B].T


def init_params(key):
    # PyTorch nn.Linear default init: U(-1/sqrt(in), 1/sqrt(in)) for W and b.
    bound = 1.0 / jnp.sqrt(jnp.float32(FEAT))
    kw, kb = jax.random.split(key)
    weights = jax.random.uniform(
        kw, (NUM_LAYERS, FEAT, FEAT), jnp.float32, -bound, bound)
    biases = jax.random.uniform(
        kb, (NUM_LAYERS, FEAT), jnp.float32, -bound, bound)
    return weights, biases


def reference(x, weights, biases):
    y = x
    for i in range(NUM_LAYERS):
        y = y @ weights[i].T + biases[i]
    return y


if __name__ == "__main__":
    key = jax.random.PRNGKey(0)
    kx, kp = jax.random.split(key)
    B = 8
    x = jax.random.normal(kx, (B, FEAT), jnp.float32)
    weights, biases = init_params(kp)

    out = multilinear(x, weights, biases)
    out = jax.block_until_ready(out)

    ref = reference(x, weights, biases)
    assert out.shape == (B, FEAT)
    assert jnp.allclose(out, ref, atol=1e-5, rtol=1e-5), (out, ref)
    print("KERNEL_OK")
</pallas_src>

<mosaic_0001>
module attributes {stable_mosaic.version = 11 : i64} {
  func.func @multilinear_kernel(%arg0: i32, %arg1: memref<40xf32, #tpu.memory_space<smem>>, %arg2: memref<20xf32, #tpu.memory_space<smem>>, %arg3: memref<2x512xf32, #tpu.memory_space<vmem>>, %arg4: memref<2x512xf32, #tpu.memory_space<vmem>>) attributes {dimension_semantics = [#tpu.dimension_semantics<parallel>], iteration_bounds = array<i64: 1>, scalar_prefetch = 0 : i64, scratch_operands = 0 : i64, tpu.core_type = #tpu.core_type<tc>, window_params = [{transform_indices = @transform_0, window_bounds = array<i64: 40>}, {transform_indices = @transform_1, window_bounds = array<i64: 20>}, {transform_indices = @transform_2, window_bounds = array<i64: 2, 512>}, {transform_indices = @transform_3, window_bounds = array<i64: 2, 512>}]} {
    %c0 = arith.constant 0 : index
    %c0_0 = arith.constant 0 : index
    %0 = vector.load %arg3[%c0, %c0_0] : memref<2x512xf32, #tpu.memory_space<vmem>>, vector<1x512xf32>
    %c1 = arith.constant 1 : index
    %c0_1 = arith.constant 0 : index
    %1 = vector.load %arg3[%c1, %c0_1] : memref<2x512xf32, #tpu.memory_space<vmem>>, vector<1x512xf32>
    %c0_2 = arith.constant 0 : index
    %2 = memref.load %arg1[%c0_2] : memref<40xf32, #tpu.memory_space<smem>>
    %c1_3 = arith.constant 1 : index
    %3 = memref.load %arg1[%c1_3] : memref<40xf32, #tpu.memory_space<smem>>
    %c2 = arith.constant 2 : index
    %4 = memref.load %arg1[%c2] : memref<40xf32, #tpu.memory_space<smem>>
    %c3 = arith.constant 3 : index
    %5 = memref.load %arg1[%c3] : memref<40xf32, #tpu.memory_space<smem>>
    %c0_4 = arith.constant 0 : index
    %6 = memref.load %arg2[%c0_4] : memref<20xf32, #tpu.memory_space<smem>>
    %c1_5 = arith.constant 1 : index
    %7 = memref.load %arg2[%c1_5] : memref<20xf32, #tpu.memory_space<smem>>
    %8 = vector.broadcast %2 : f32 to vector<1x512xf32>
    %9 = arith.mulf %0, %8 : vector<1x512xf32>
    %10 = vector.broadcast %3 : f32 to vector<1x512xf32>
    %11 = arith.mulf %1, %10 : vector<1x512xf32>
    %12 = arith.addf %9, %11 : vector<1x512xf32>
    %13 = vector.broadcast %6 : f32 to vector<1x512xf32>
    %14 = arith.addf %12, %13 : vector<1x512xf32>
    %15 = vector.broadcast %4 : f32 to vector<1x512xf32>
    %16 = arith.mulf %0, %15 : vector<1x512xf32>
    %17 = vector.broadcast %5 : f32 to vector<1x512xf32>
    %18 = arith.mulf %1, %17 : vector<1x512xf32>
    %19 = arith.addf %16, %18 : vector<1x512xf32>
    %20 = vector.broadcast %7 : f32 to vector<1x512xf32>
    %21 = arith.addf %19, %20 : vector<1x512xf32>
    %c4 = arith.constant 4 : index
    %22 = memref.load %arg1[%c4] : memref<40xf32, #tpu.memory_space<smem>>
    %c5 = arith.constant 5 : index
    %23 = memref.load %arg1[%c5] : memref<40xf32, #tpu.memory_space<smem>>
    %c6 = arith.constant 6 : index
    %24 = memref.load %arg1[%c6] : memref<40xf32, #tpu.memory_space<smem>>
    %c7 = arith.constant 7 : index
    %25 = memref.load %arg1[%c7] : memref<40xf32, #tpu.memory_space<smem>>
    %c2_6 = arith.constant 2 : index
    %26 = memref.load %arg2[%c2_6] : memref<20xf32, #tpu.memory_space<smem>>
    %c3_7 = arith.constant 3 : index
    %27 = memref.load %arg2[%c3_7] : memref<20xf32, #tpu.memory_space<smem>>
    %28 = vector.broadcast %22 : f32 to vector<1x512xf32>
    %29 = arith.mulf %14, %28 : vector<1x512xf32>
    %30 = vector.broadcast %23 : f32 to vector<1x512xf32>
    %31 = arith.mulf %21, %30 : vector<1x512xf32>
    %32 = arith.addf %29, %31 : vector<1x512xf32>
    %33 = vector.broadcast %26 : f32 to vector<1x512xf32>
    %34 = arith.addf %32, %33 : vector<1x512xf32>
    %35 = vector.broadcast %24 : f32 to vector<1x512xf32>
    %36 = arith.mulf %14, %35 : vector<1x512xf32>
    %37 = vector.broadcast %25 : f32 to vector<1x512xf32>
    %38 = arith.mulf %21, %37 : vector<1x512xf32>
    %39 = arith.addf %36, %38 : vector<1x512xf32>
    %40 = vector.broadcast %27 : f32 to vector<1x512xf32>
    %41 = arith.addf %39, %40 : vector<1x512xf32>
    %c8 = arith.constant 8 : index
    %42 = memref.load %arg1[%c8] : memref<40xf32, #tpu.memory_space<smem>>
    %c9 = arith.constant 9 : index
    %43 = memref.load %arg1[%c9] : memref<40xf32, #tpu.memory_space<smem>>
    %c10 = arith.constant 10 : index
    %44 = memref.load %arg1[%c10] : memref<40xf32, #tpu.memory_space<smem>>
    %c11 = arith.constant 11 : index
    %45 = memref.load %arg1[%c11] : memref<40xf32, #tpu.memory_space<smem>>
    %c4_8 = arith.constant 4 : index
    %46 = memref.load %arg2[%c4_8] : memref<20xf32, #tpu.memory_space<smem>>
    %c5_9 = arith.constant 5 : index
    %47 = memref.load %arg2[%c5_9] : memref<20xf32, #tpu.memory_space<smem>>
    %48 = vector.broadcast %42 : f32 to vector<1x512xf32>
    %49 = arith.mulf %34, %48 : vector<1x512xf32>
    %50 = vector.broadcast %43 : f32 to vector<1x512xf32>
    %51 = arith.mulf %41, %50 : vector<1x512xf32>
    %52 = arith.addf %49, %51 : vector<1x512xf32>
    %53 = vector.broadcast %46 : f32 to vector<1x512xf32>
    %54 = arith.addf %52, %53 : vector<1x512xf32>
    %55 = vector.broadcast %44 : f32 to vector<1x512xf32>
    %56 = arith.mulf %34, %55 : vector<1x512xf32>
    %57 = vector.broadcast %45 : f32 to vector<1x512xf32>
    %58 = arith.mulf %41, %57 : vector<1x512xf32>
    %59 = arith.addf %56, %58 : vector<1x512xf32>
    %60 = vector.broadcast %47 : f32 to vector<1x512xf32>
    %61 = arith.addf %59, %60 : vector<1x512xf32>
    %c12 = arith.constant 12 : index
    %62 = memref.load %arg1[%c12] : memref<40xf32, #tpu.memory_space<smem>>
    %c13 = arith.constant 13 : index
    %63 = memref.load %arg1[%c13] : memref<40xf32, #tpu.memory_space<smem>>
    %c14 = arith.constant 14 : index
    %64 = memref.load %arg1[%c14] : memref<40xf32, #tpu.memory_space<smem>>
    %c15 = arith.constant 15 : index
    %65 = memref.load %arg1[%c15] : memref<40xf32, #tpu.memory_space<smem>>
    %c6_10 = arith.constant 6 : index
    %66 = memref.load %arg2[%c6_10] : memref<20xf32, #tpu.memory_space<smem>>
    %c7_11 = arith.constant 7 : index
    %67 = memref.load %arg2[%c7_11] : memref<20xf32, #tpu.memory_space<smem>>
    %68 = vector.broadcast %62 : f32 to vector<1x512xf32>
    %69 = arith.mulf %54, %68 : vector<1x512xf32>
    %70 = vector.broadcast %63 : f32 to vector<1x512xf32>
    %71 = arith.mulf %61, %70 : vector<1x512xf32>
    %72 = arith.addf %69, %71 : vector<1x512xf32>
    %73 = vector.broadcast %66 : f32 to vector<1x512xf32>
    %74 = arith.addf %72, %73 : vector<1x512xf32>
    %75 = vector.broadcast %64 : f32 to vector<1x512xf32>
    %76 = arith.mulf %54, %75 : vector<1x512xf32>
    %77 = vector.broadcast %65 : f32 to vector<1x512xf32>
    %78 = arith.mulf %61, %77 : vector<1x512xf32>
    %79 = arith.addf %76, %78 : vector<1x512xf32>
    %80 = vector.broadcast %67 : f32 to vector<1x512xf32>
    %81 = arith.addf %79, %80 : vector<1x512xf32>
    %c16 = arith.constant 16 : index
    %82 = memref.load %arg1[%c16] : memref<40xf32, #tpu.memory_space<smem>>
    %c17 = arith.constant 17 : index
    %83 = memref.load %arg1[%c17] : memref<40xf32, #tpu.memory_space<smem>>
    %c18 = arith.constant 18 : index
    %84 = memref.load %arg1[%c18] : memref<40xf32, #tpu.memory_space<smem>>
    %c19 = arith.constant 19 : index
    %85 = memref.load %arg1[%c19] : memref<40xf32, #tpu.memory_space<smem>>
    %c8_12 = arith.constant 8 : index
    %86 = memref.load %arg2[%c8_12] : memref<20xf32, #tpu.memory_space<smem>>
    %c9_13 = arith.constant 9 : index
    %87 = memref.load %arg2[%c9_13] : memref<20xf32, #tpu.memory_space<smem>>
    %88 = vector.broadcast %82 : f32 to vector<1x512xf32>
    %89 = arith.mulf %74, %88 : vector<1x512xf32>
    %90 = vector.broadcast %83 : f32 to vector<1x512xf32>
    %91 = arith.mulf %81, %90 : vector<1x512xf32>
    %92 = arith.addf %89, %91 : vector<1x512xf32>
    %93 = vector.broadcast %86 : f32 to vector<1x512xf32>
    %94 = arith.addf %92, %93 : vector<1x512xf32>
    %95 = vector.broadcast %84 : f32 to vector<1x512xf32>
    %96 = arith.mulf %74, %95 : vector<1x512xf32>
    %97 = vector.broadcast %85 : f32 to vector<1x512xf32>
    %98 = arith.mulf %81, %97 : vector<1x512xf32>
    %99 = arith.addf %96, %98 : vector<1x512xf32>
    %100 = vector.broadcast %87 : f32 to vector<1x512xf32>
    %101 = arith.addf %99, %100 : vector<1x512xf32>
    %c20 = arith.constant 20 : index
    %102 = memref.load %arg1[%c20] : memref<40xf32, #tpu.memory_space<smem>>
    %c21 = arith.constant 21 : index
    %103 = memref.load %arg1[%c21] : memref<40xf32, #tpu.memory_space<smem>>
    %c22 = arith.constant 22 : index
    %104 = memref.load %arg1[%c22] : memref<40xf32, #tpu.memory_space<smem>>
    %c23 = arith.constant 23 : index
    %105 = memref.load %arg1[%c23] : memref<40xf32, #tpu.memory_space<smem>>
    %c10_14 = arith.constant 10 : index
    %106 = memref.load %arg2[%c10_14] : memref<20xf32, #tpu.memory_space<smem>>
    %c11_15 = arith.constant 11 : index
    %107 = memref.load %arg2[%c11_15] : memref<20xf32, #tpu.memory_space<smem>>
    %108 = vector.broadcast %102 : f32 to vector<1x512xf32>
    %109 = arith.mulf %94, %108 : vector<1x512xf32>
    %110 = vector.broadcast %103 : f32 to vector<1x512xf32>
    %111 = arith.mulf %101, %110 : vector<1x512xf32>
    %112 = arith.addf %109, %111 : vector<1x512xf32>
    %113 = vector.broadcast %106 : f32 to vector<1x512xf32>
    %114 = arith.addf %112, %113 : vector<1x512xf32>
    %115 = vector.broadcast %104 : f32 to vector<1x512xf32>
    %116 = arith.mulf %94, %115 : vector<1x512xf32>
    %117 = vector.broadcast %105 : f32 to vector<1x512xf32>
    %118 = arith.mulf %101, %117 : vector<1x512xf32>
    %119 = arith.addf %116, %118 : vector<1x512xf32>
    %120 = vector.broadcast %107 : f32 to vector<1x512xf32>
    %121 = arith.addf %119, %120 : vector<1x512xf32>
    %c24 = arith.constant 24 : index
    %122 = memref.load %arg1[%c24] : memref<40xf32, #tpu.memory_space<smem>>
    %c25 = arith.constant 25 : index
    %123 = memref.load %arg1[%c25] : memref<40xf32, #tpu.memory_space<smem>>
    %c26 = arith.constant 26 : index
    %124 = memref.load %arg1[%c26] : memref<40xf32, #tpu.memory_space<smem>>
    %c27 = arith.constant 27 : index
    %125 = memref.load %arg1[%c27] : memref<40xf32, #tpu.memory_space<smem>>
    %c12_16 = arith.constant 12 : index
    %126 = memref.load %arg2[%c12_16] : memref<20xf32, #tpu.memory_space<smem>>
    %c13_17 = arith.constant 13 : index
    %127 = memref.load %arg2[%c13_17] : memref<20xf32, #tpu.memory_space<smem>>
    %128 = vector.broadcast %122 : f32 to vector<1x512xf32>
    %129 = arith.mulf %114, %128 : vector<1x512xf32>
    %130 = vector.broadcast %123 : f32 to vector<1x512xf32>
    %131 = arith.mulf %121, %130 : vector<1x512xf32>
    %132 = arith.addf %129, %131 : vector<1x512xf32>
    %133 = vector.broadcast %126 : f32 to vector<1x512xf32>
    %134 = arith.addf %132, %133 : vector<1x512xf32>
    %135 = vector.broadcast %124 : f32 to vector<1x512xf32>
    %136 = arith.mulf %114, %135 : vector<1x512xf32>
    %137 = vector.broadcast %125 : f32 to vector<1x512xf32>
    %138 = arith.mulf %121, %137 : vector<1x512xf32>
    %139 = arith.addf %136, %138 : vector<1x512xf32>
    %140 = vector.broadcast %127 : f32 to vector<1x512xf32>
    %141 = arith.addf %139, %140 : vector<1x512xf32>
    %c28 = arith.constant 28 : index
    %142 = memref.load %arg1[%c28] : memref<40xf32, #tpu.memory_space<smem>>
    %c29 = arith.constant 29 : index
    %143 = memref.load %arg1[%c29] : memref<40xf32, #tpu.memory_space<smem>>
    %c30 = arith.constant 30 : index
    %144 = memref.load %arg1[%c30] : memref<40xf32, #tpu.memory_space<smem>>
    %c31 = arith.constant 31 : index
    %145 = memref.load %arg1[%c31] : memref<40xf32, #tpu.memory_space<smem>>
    %c14_18 = arith.constant 14 : index
    %146 = memref.load %arg2[%c14_18] : memref<20xf32, #tpu.memory_space<smem>>
    %c15_19 = arith.constant 15 : index
    %147 = memref.load %arg2[%c15_19] : memref<20xf32, #tpu.memory_space<smem>>
    %148 = vector.broadcast %142 : f32 to vector<1x512xf32>
    %149 = arith.mulf %134, %148 : vector<1x512xf32>
    %150 = vector.broadcast %143 : f32 to vector<1x512xf32>
    %151 = arith.mulf %141, %150 : vector<1x512xf32>
    %152 = arith.addf %149, %151 : vector<1x512xf32>
    %153 = vector.broadcast %146 : f32 to vector<1x512xf32>
    %154 = arith.addf %152, %153 : vector<1x512xf32>
    %155 = vector.broadcast %144 : f32 to vector<1x512xf32>
    %156 = arith.mulf %134, %155 : vector<1x512xf32>
    %157 = vector.broadcast %145 : f32 to vector<1x512xf32>
    %158 = arith.mulf %141, %157 : vector<1x512xf32>
    %159 = arith.addf %156, %158 : vector<1x512xf32>
    %160 = vector.broadcast %147 : f32 to vector<1x512xf32>
    %161 = arith.addf %159, %160 : vector<1x512xf32>
    %c32 = arith.constant 32 : index
    %162 = memref.load %arg1[%c32] : memref<40xf32, #tpu.memory_space<smem>>
    %c33 = arith.constant 33 : index
    %163 = memref.load %arg1[%c33] : memref<40xf32, #tpu.memory_space<smem>>
    %c34 = arith.constant 34 : index
    %164 = memref.load %arg1[%c34] : memref<40xf32, #tpu.memory_space<smem>>
    %c35 = arith.constant 35 : index
    %165 = memref.load %arg1[%c35] : memref<40xf32, #tpu.memory_space<smem>>
    %c16_20 = arith.constant 16 : index
    %166 = memref.load %arg2[%c16_20] : memref<20xf32, #tpu.memory_space<smem>>
    %c17_21 = arith.constant 17 : index
    %167 = memref.load %arg2[%c17_21] : memref<20xf32, #tpu.memory_space<smem>>
    %168 = vector.broadcast %162 : f32 to vector<1x512xf32>
    %169 = arith.mulf %154, %168 : vector<1x512xf32>
    %170 = vector.broadcast %163 : f32 to vector<1x512xf32>
    %171 = arith.mulf %161, %170 : vector<1x512xf32>
    %172 = arith.addf %169, %171 : vector<1x512xf32>
    %173 = vector.broadcast %166 : f32 to vector<1x512xf32>
    %174 = arith.addf %172, %173 : vector<1x512xf32>
    %175 = vector.broadcast %164 : f32 to vector<1x512xf32>
    %176 = arith.mulf %154, %175 : vector<1x512xf32>
    %177 = vector.broadcast %165 : f32 to vector<1x512xf32>
    %178 = arith.mulf %161, %177 : vector<1x512xf32>
    %179 = arith.addf %176, %178 : vector<1x512xf32>
    %180 = vector.broadcast %167 : f32 to vector<1x512xf32>
    %181 = arith.addf %179, %180 : vector<1x512xf32>
    %c36 = arith.constant 36 : index
    %182 = memref.load %arg1[%c36] : memref<40xf32, #tpu.memory_space<smem>>
    %c37 = arith.constant 37 : index
    %183 = memref.load %arg1[%c37] : memref<40xf32, #tpu.memory_space<smem>>
    %c38 = arith.constant 38 : index
    %184 = memref.load %arg1[%c38] : memref<40xf32, #tpu.memory_space<smem>>
    %c39 = arith.constant 39 : index
    %185 = memref.load %arg1[%c39] : memref<40xf32, #tpu.memory_space<smem>>
    %c18_22 = arith.constant 18 : index
    %186 = memref.load %arg2[%c18_22] : memref<20xf32, #tpu.memory_space<smem>>
    %c19_23 = arith.constant 19 : index
    %187 = memref.load %arg2[%c19_23] : memref<20xf32, #tpu.memory_space<smem>>
    %188 = vector.broadcast %182 : f32 to vector<1x512xf32>
    %189 = arith.mulf %174, %188 : vector<1x512xf32>
    %190 = vector.broadcast %183 : f32 to vector<1x512xf32>
    %191 = arith.mulf %181, %190 : vector<1x512xf32>
    %192 = arith.addf %189, %191 : vector<1x512xf32>
    %193 = vector.broadcast %186 : f32 to vector<1x512xf32>
    %194 = arith.addf %192, %193 : vector<1x512xf32>
    %195 = vector.broadcast %184 : f32 to vector<1x512xf32>
    %196 = arith.mulf %174, %195 : vector<1x512xf32>
    %197 = vector.broadcast %185 : f32 to vector<1x512xf32>
    %198 = arith.mulf %181, %197 : vector<1x512xf32>
    %199 = arith.addf %196, %198 : vector<1x512xf32>
    %200 = vector.broadcast %187 : f32 to vector<1x512xf32>
    %201 = arith.addf %199, %200 : vector<1x512xf32>
    %c0_24 = arith.constant 0 : index
    %c0_25 = arith.constant 0 : index
    %202 = vector.load %arg4[%c0_24, %c0_25] : memref<2x512xf32, #tpu.memory_space<vmem>>, vector<1x512xf32>
    tpu.vector_store %arg4[%c0_24, %c0_25], %194 {strides = array<i32>} : memref<2x512xf32, #tpu.memory_space<vmem>>, vector<1x512xf32>,
    %c1_26 = arith.constant 1 : index
    %c0_27 = arith.constant 0 : index
    %203 = vector.load %arg4[%c1_26, %c0_27] : memref<2x512xf32, #tpu.memory_space<vmem>>, vector<1x512xf32>
    tpu.vector_store %arg4[%c1_26, %c0_27], %201 {strides = array<i32>} : memref<2x512xf32, #tpu.memory_space<vmem>>, vector<1x512xf32>,
    return
  }
  func.func @transform_0(%arg0: i32) -> i32 {
    %c0_i32 = arith.constant 0 : i32
    %c0_i32_0 = arith.constant 0 : i32
    return %c0_i32 : i32
  }
  func.func @transform_1(%arg0: i32) -> i32 {
    %c0_i32 = arith.constant 0 : i32
    %c0_i32_0 = arith.constant 0 : i32
    return %c0_i32 : i32
  }
  func.func @transform_2(%arg0: i32) -> (i32, i32) {
    %c0_i32 = arith.constant 0 : i32
    %c0_i32_0 = arith.constant 0 : i32
    return %c0_i32, %arg0 : i32, i32
  }
  func.func @transform_3(%arg0: i32) -> (i32, i32) {
    %c0_i32 = arith.constant 0 : i32
    %c0_i32_0 = arith.constant 0 : i32
    return %c0_i32, %arg0 : i32, i32
  }
}

</mosaic_0001>

<bundles_post_ra>
// kernel: tpu_custom_call.1
= control target key start
LH: loop header
LB: loop body
LE: loop exit
PB: predicated region body
PF: predicated region fallthrough
CT: control target
= control target key end

     0   :  { %8 = vsyncpa [#allocation5], 0  ;;  %s617_s0 = inlined_call_operand.hbm [shape: f32[40], index: 0, kind: input, shape index: {}]   ;;  %s618_s1 = inlined_call_operand.vmem [shape: f32[20], index: 1, kind: input, shape index: {}]   ;;  %s619_s2 = inlined_call_operand.hbm [shape: f32[2,512], index: 2, kind: input, shape index: {}]   ;;  %s620_s3 = inlined_call_operand.hbm [shape: f32[2,512], index: 3, kind: output, shape index: {}]  }
   0x1   :  { %9 = vsyncpa [#allocation6], 0 }
   0x2   :  { %10 = vsyncpa [#allocation3], 0 }
   0x3   :  { %11 = vsyncpa [#allocation4], 0  ;;  %s26_s14 = sshll.u32 %s618_s1, 4  ;;  %s339_s17 = scalar_lea.hbm %s617_s0, 16  ;;  %s27_s14 = int_to_ptr.vmem [resolvable:$true] %s26_s14 }
   0x4   :  { %p340_p0 = scmp.ne.s32.totalorder %s617_s0, %s339_s17  ;;  %p343_p1 = scmp.lt.u32.totalorder %s339_s17, %s617_s0 }
   0x6   :  { %p345_p2 = pnand %p343_p1, %p340_p0 }
   0x8   :  { %348 = shalt.err (!%p345_p2)
}
   0x9   :  { %s413_s22 = smov [#allocation2]   ;;  %s349_s1 = scalar_lea.vmem %s27_s14, 16 }
   0xa   :  { %19 = dma.hbm_to_smem %s617_s0, 16, %s413_s22, [#allocation5]  }
   0xb   :  { %p350_p3 = scmp.ne.s32.totalorder %s27_s14, %s349_s1  ;;  %p354_p4 = scmp.lt.s32.totalorder %s27_s14, %s27_s14 }
   0xc   :  { %p355_p5 = scmp.lt.s32.totalorder %s349_s1, %s349_s1 }
   0xe   :  { %p356_p6 = por %p355_p5, %p354_p4 }
  0x10   :  { %p357_p7 = pnand %p356_p6, %p350_p3 }
  0x12   :  { %360 = shalt.err (!%p357_p7)
}
  0x13   :  { %s414_s25 = smov [#allocation7]   ;;  %s415_s26 = smov [#allocation8]  }
  0x14   :  { %29 = dma.vmem_to_smem %s27_s14, 16, %s414_s25, [#allocation6]  }
  0x15   :  { %s36_s27 = sshll.u32 %s415_s26, 4  ;;  %s361_s30 = scalar_lea.hbm %s619_s2, 128  ;;  %s37_s27 = int_to_ptr.vmem [resolvable:$true] %s36_s27 }
  0x16   :  { %p362_p8 = scmp.ne.s32.totalorder %s619_s2, %s361_s30  ;;  %p365_p9 = scmp.lt.u32.totalorder %s361_s30, %s619_s2 }
  0x18   :  { %p367_p10 = pnand %p365_p9, %p362_p8 }
  0x1a   :  { %370 = shalt.err (!%p367_p10)
}
  0x1b   :  { %s371_s7 = scalar_lea.vmem %s37_s27, 128  ;;  %p376_p12 = scmp.lt.s32.totalorder %s37_s27, %s37_s27 }
  0x1c   :  { %p372_p11 = scmp.ne.s32.totalorder %s37_s27, %s371_s7  ;;  %p377_p13 = scmp.lt.s32.totalorder %s371_s7, %s371_s7 }
  0x1e   :  { %p378_p0 = por %p377_p13, %p376_p12 }
  0x20   :  { %p379_p1 = pnand %p378_p0, %p372_p11 }
  0x22   :  { %382 = shalt.err (!%p379_p1)
}
  0x23   :  { %39 = dma.hbm_to_vmem [thread:$0]  %s619_s2, 128, %s37_s27, [#allocation3]  }
  0x24   :  { %405 = dma.done.wait [#allocation5], 16  }
  0x25   :  { %406 = vsyncadd [#allocation5], 4294967280 }
  0x26   :  { %407 = dma.done.wait [#allocation6], 16  }
  0x27   :  { %408 = vsyncadd [#allocation6], 4294967280 }
  0x28   :  { %409 = dma.done.wait [#allocation3], 128  }
  0x29   :  { %410 = vsyncadd [#allocation3], 4294967168 }
  0x2a   :  { %49 = sfence }
  0x2b   :  { %s53_s10 = sld [smem:[#allocation2]]  ;;  %s277_s11 = sld [smem:[#allocation2 + $0x1]]  ;;  %v50_v0 = vld [vmem:[#allocation8] ss:$2 sm:$0xf] }
  0x2c   :  { %s278_s12 = sld [smem:[#allocation2 + $0x2]]  ;;  %s279_s13 = sld [smem:[#allocation2 + $0x3]]  ;;  %v52_v1 = vld [vmem:[#allocation8 + $0x1] ss:$2 sm:$0xf] }
  0x2d   :  { %s57_s14 = sld [smem:[#allocation7]]  ;;  %s280_s15 = sld [smem:[#allocation7 + $0x1]] }
  0x2e   :  { %s281_s16 = sld [smem:[#allocation2 + $0x4]]  ;;  %s464_s17 = sld [smem:[#allocation2 + $0x5]] }
  0x2f   :  { %s283_s18 = sld [smem:[#allocation2 + $0x6]]  ;;  %s284_s2 = sld [smem:[#allocation2 + $0x7]] }
  0x30   :  { %s466_s19 = sld [smem:[#allocation7 + $0x2]]  ;;  %s468_s20 = sld [smem:[#allocation7 + $0x3]] }
  0x31   :  { %v59_v2 = vstv %s53_s10  ;;  %v61_v3 = vstv %s277_s11  ;;  %s470_s21 = sld [smem:[#allocation2 + $0x8]]  ;;  %s472_s22 = sld [smem:[#allocation2 + $0x9]] }
  0x32   :  { %v60_v4 = vmul.f32 %v59_v2, %v50_v0  ;;  %v62_v5 = vmul.f32 %v61_v3, %v52_v1  ;;  %v66_v6 = vstv %s278_s12  ;;  %v68_v7 = vstv %s279_s13  ;;  %s474_s23 = sld [smem:[#allocation2 + $0xa]]  ;;  %s476_s24 = sld [smem:[#allocation2 + $0xb]] }
  0x33   :  { %v64_v8 = vstv %s57_s14  ;;  %v67_v9 = vmul.f32 %v66_v6, %v50_v0  ;;  %v69_v10 = vmul.f32 %v68_v7, %v52_v1  ;;  %v71_v12 = vstv %s280_s15  ;;  %s479_s1 = sld [smem:[#allocation7 + $0x4]]  ;;  %s481_s25 = sld [smem:[#allocation7 + $0x5]] }
  0x34   :  { %v63_v11 = vadd.f32 %v62_v5, %v60_v4  ;;  %v79_v14 = vstv %s281_s16  ;;  %v81_v17 = vstv %s464_s17  ;;  %s483_s26 = sld [smem:[#allocation2 + $0xc]]  ;;  %s485_s27 = sld [smem:[#allocation2 + $0xd]] }
  0x35   :  { %v70_v13 = vadd.f32 %v69_v10, %v67_v9  ;;  %v86_v15 = vstv %s283_s18  ;;  %v88_v18 = vstv %s284_s2  ;;  %s489_s28 = sld [smem:[#allocation2 + $0xe]]  ;;  %s491_s29 = sld [smem:[#allocation2 + $0xf]] }
  0x36   :  { %v65_v16 = vadd.f32 %v64_v8, %v63_v11  ;;  %v84_v24 = vstv %s466_s19  ;;  %v91_v25 = vstv %s468_s20  ;;  %s497_s30 = sld [smem:[#allocation7 + $0x6]]  ;;  %s499_s4 = sld [smem:[#allocation7 + $0x7]] }
  0x37   :  { %v72_v19 = vadd.f32 %v71_v12, %v70_v13  ;;  %v99_v28 = vstv %s470_s21  ;;  %v101_v29 = vstv %s472_s22  ;;  %s501_s5 = sld [smem:[#allocation2 + $0x10]]  ;;  %s503_s0 = sld [smem:[#allocation2 + $0x11]] }
  0x38   :  { %v80_v20 = vmul.f32 %v79_v14, %v65_v16  ;;  %v87_v21 = vmul.f32 %v86_v15, %v65_v16  ;;  %v106_v30 = vstv %s474_s23  ;;  %v108_v31 = vstv %s476_s24  ;;  %s507_s6 = sld [smem:[#allocation2 + $0x12]]  ;;  %s509_s7 = sld [smem:[#allocation2 + $0x13]] }
  0x39   :  { %v82_v22 = vmul.f32 %v81_v17, %v72_v19  ;;  %v89_v23 = vmul.f32 %v88_v18, %v72_v19  ;;  %v104_v38 = vstv %s479_s1  ;;  %v111_v39 = vstv %s481_s25  ;;  %s515_s8 = sld [smem:[#allocation7 + $0x8]]  ;;  %s517_s9 = sld [smem:[#allocation7 + $0x9]] }
  0x3a   :  { %v119_v42 = vstv %s483_s26  ;;  %v121_v43 = vstv %s485_s27  ;;  %s519_s10 = sld [smem:[#allocation2 + $0x14]]  ;;  %s521_s11 = sld [smem:[#allocation2 + $0x15]] }
  0x3b   :  { %v83_v26 = vadd.f32 %v82_v22, %v80_v20  ;;  %v90_v27 = vadd.f32 %v89_v23, %v87_v21  ;;  %v126_v44 = vstv %s489_s28  ;;  %v128_v45 = vstv %s491_s29  ;;  %s525_s12 = sld [smem:[#allocation2 + $0x16]]  ;;  %s527_s13 = sld [smem:[#allocation2 + $0x17]] }
  0x3c   :  { %v124_v52 = vstv %s497_s30  ;;  %v131_v53 = vstv %s499_s4  ;;  %s533_s14 = sld [smem:[#allocation7 + $0xa]]  ;;  %s535_s15 = sld [smem:[#allocation7 + $0xb]] }
  0x3d   :  { %v85_v32 = vadd.f32 %v84_v24, %v83_v26  ;;  %v92_v33 = vadd.f32 %v91_v25, %v90_v27  ;;  %v139_v56 = vstv %s501_s5  ;;  %v141_v57 = vstv %s503_s0  ;;  %s537_s16 = sld [smem:[#allocation2 + $0x18]]  ;;  %s539_s17 = sld [smem:[#allocation2 + $0x19]] }
  0x3e   :  { %v146_v58 = vstv %s507_s6  ;;  %v148_v59 = vstv %s509_s7  ;;  %s543_s18 = sld [smem:[#allocation2 + $0x1a]]  ;;  %s545_s2 = sld [smem:[#allocation2 + $0x1b]] }
  0x3f   :  { %v100_v34 = vmul.f32 %v99_v28, %v85_v32  ;;  %v102_v35 = vmul.f32 %v101_v29, %v92_v33  ;;  %v107_v36 = vmul.f32 %v106_v30, %v85_v32  ;;  %v109_v37 = vmul.f32 %v108_v31, %v92_v33  ;;  %s551_s19 = sld [smem:[#allocation7 + $0xc]]  ;;  %s553_s20 = sld [smem:[#allocation7 + $0xd]] }
  0x40   :  { %v144_v2 = vstv %s515_s8  ;;  %v151_v3 = vstv %s517_s9  ;;  %v159_v6 = vstv %s519_s10  ;;  %v161_v7 = vstv %s521_s11  ;;  %s555_s21 = sld [smem:[#allocation2 + $0x1c]]  ;;  %s557_s22 = sld [smem:[#allocation2 + $0x1d]] }
  0x41   :  { %v103_v40 = vadd.f32 %v102_v35, %v100_v34  ;;  %v110_v41 = vadd.f32 %v109_v37, %v107_v36  ;;  %v166_v8 = vstv %s525_s12  ;;  %v168_v9 = vstv %s527_s13  ;;  %s561_s23 = sld [smem:[#allocation2 + $0x1e]]  ;;  %s563_s24 = sld [smem:[#allocation2 + $0x1f]] }
  0x42   :  { %v164_v16 = vstv %s533_s14  ;;  %v171_v17 = vstv %s535_s15  ;;  %s569_s1 = sld [smem:[#allocation7 + $0xe]]  ;;  %s571_s25 = sld [smem:[#allocation7 + $0xf]] }
  0x43   :  { %v105_v46 = vadd.f32 %v104_v38, %v103_v40  ;;  %v112_v47 = vadd.f32 %v111_v39, %v110_v41  ;;  %v179_v20 = vstv %s537_s16  ;;  %v181_v21 = vstv %s539_s17  ;;  %s573_s26 = sld [smem:[#allocation2 + $0x20]]  ;;  %s575_s27 = sld [smem:[#allocation2 + $0x21]] }
  0x44   :  { %v186_v22 = vstv %s543_s18  ;;  %v188_v23 = vstv %s545_s2  ;;  %s579_s28 = sld [smem:[#allocation2 + $0x22]]  ;;  %s581_s29 = sld [smem:[#allocation2 + $0x23]] }
  0x45   :  { %v120_v48 = vmul.f32 %v119_v42, %v105_v46  ;;  %v122_v49 = vmul.f32 %v121_v43, %v112_v47  ;;  %v127_v50 = vmul.f32 %v126_v44, %v105_v46  ;;  %v129_v51 = vmul.f32 %v128_v45, %v112_v47  ;;  %s587_s30 = sld [smem:[#allocation7 + $0x10]]  ;;  %s589_s4 = sld [smem:[#allocation7 + $0x11]] }
  0x46   :  { %v184_v30 = vstv %s551_s19  ;;  %v191_v31 = vstv %s553_s20  ;;  %v199_v34 = vstv %s555_s21  ;;  %v201_v35 = vstv %s557_s22  ;;  %s591_s5 = sld [smem:[#allocation2 + $0x24]]  ;;  %s593_s0 = sld [smem:[#allocation2 + $0x25]] }
  0x47   :  { %v123_v54 = vadd.f32 %v122_v49, %v120_v48  ;;  %v130_v55 = vadd.f32 %v129_v51, %v127_v50  ;;  %v206_v36 = vstv %s561_s23  ;;  %v208_v37 = vstv %s563_s24  ;;  %s331_s6 = sld [smem:[#allocation2 + $0x26]]  ;;  %s332_s7 = sld [smem:[#allocation2 + $0x27]] }
  0x48   :  { %v204_v44 = vstv %s569_s1  ;;  %v211_v45 = vstv %s571_s25  ;;  %s333_s8 = sld [smem:[#allocation7 + $0x12]]  ;;  %s334_s9 = sld [smem:[#allocation7 + $0x13]] }
  0x49   :  { %v125_v60 = vadd.f32 %v124_v52, %v123_v54  ;;  %v132_v61 = vadd.f32 %v131_v53, %v130_v55  ;;  %v219_v48 = vstv %s573_s26  ;;  %v221_v49 = vstv %s575_s27  ;;  %s416_s10 = smov [#allocation9]  }
  0x4a   :  { %v226_v50 = vstv %s579_s28  ;;  %v228_v51 = vstv %s581_s29  ;;  %s266_s11 = sshll.u32 %s416_s10, 4  ;;  %s267_s11 = int_to_ptr.vmem [resolvable:$true] %s266_s11 }
  0x4b   :  { %v140_v62 = vmul.f32 %v139_v56, %v125_v60  ;;  %v142_v63 = vmul.f32 %v141_v57, %v132_v61  ;;  %v147_v0 = vmul.f32 %v146_v58, %v125_v60  ;;  %v149_v1 = vmul.f32 %v148_v59, %v132_v61  ;;  %s383_s12 = scalar_lea.vmem %s267_s11, 128  ;;  %p388_p3 = scmp.lt.s32.totalorder %s267_s11, %s267_s11 }
  0x4c   :  { %v224_v58 = vstv %s587_s30  ;;  %v231_v59 = vstv %s589_s4  ;;  %p384_p2 = scmp.ne.s32.totalorder %s267_s11, %s383_s12  ;;  %p389_p4 = scmp.lt.s32.totalorder %s383_s12, %s383_s12 }
  0x4d   :  { %v143_v4 = vadd.f32 %v142_v63, %v140_v62  ;;  %v150_v5 = vadd.f32 %v149_v1, %v147_v0  ;;  %v239_v62 = vstv %s591_s5  ;;  %v241_v63 = vstv %s593_s0 }
  0x4e   :  { %v246_v0 = vstv %s331_s6  ;;  %v248_v1 = vstv %s332_s7  ;;  %p390_p5 = por %p389_p4, %p388_p3 }
  0x4f   :  { %v145_v10 = vadd.f32 %v144_v2, %v143_v4  ;;  %v152_v11 = vadd.f32 %v151_v3, %v150_v5  ;;  %v253_v4 = vlaneseq }
  0x50   :  { %p391_p6 = pnand %p390_p5, %p384_p2 }
  0x51   :  { %v160_v12 = vmul.f32 %v159_v6, %v145_v10  ;;  %v162_v13 = vmul.f32 %v161_v7, %v152_v11  ;;  %v167_v14 = vmul.f32 %v166_v8, %v145_v10  ;;  %v169_v15 = vmul.f32 %v168_v9, %v152_v11 }
  0x52   :  { %v244_v9 = vstv %s333_s8  ;;  %v251_v10 = vstv %s334_s9  ;;  %vm255_vm0 = vcmp.lt.s32.totalorder %v253_v4, 512 }
  0x53   :  { %v163_v18 = vadd.f32 %v162_v13, %v160_v12  ;;  %v170_v19 = vadd.f32 %v169_v15, %v167_v14 }
  0x55   :  { %v165_v24 = vadd.f32 %v164_v16, %v163_v18  ;;  %v172_v25 = vadd.f32 %v171_v17, %v170_v19 }
  0x57   :  { %v180_v26 = vmul.f32 %v179_v20, %v165_v24  ;;  %v182_v27 = vmul.f32 %v181_v21, %v172_v25  ;;  %v187_v28 = vmul.f32 %v186_v22, %v165_v24  ;;  %v189_v29 = vmul.f32 %v188_v23, %v172_v25 }
  0x59   :  { %v183_v32 = vadd.f32 %v182_v27, %v180_v26  ;;  %v190_v33 = vadd.f32 %v189_v29, %v187_v28 }
  0x5b   :  { %v185_v38 = vadd.f32 %v184_v30, %v183_v32  ;;  %v192_v39 = vadd.f32 %v191_v31, %v190_v33 }
  0x5d   :  { %v200_v40 = vmul.f32 %v199_v34, %v185_v38  ;;  %v202_v41 = vmul.f32 %v201_v35, %v192_v39  ;;  %v207_v42 = vmul.f32 %v206_v36, %v185_v38  ;;  %v209_v43 = vmul.f32 %v208_v37, %v192_v39 }
  0x5f   :  { %v203_v46 = vadd.f32 %v202_v41, %v200_v40  ;;  %v210_v47 = vadd.f32 %v209_v43, %v207_v42 }
  0x61   :  { %v205_v52 = vadd.f32 %v204_v44, %v203_v46  ;;  %v212_v53 = vadd.f32 %v211_v45, %v210_v47 }
  0x63   :  { %v220_v54 = vmul.f32 %v219_v48, %v205_v52  ;;  %v222_v55 = vmul.f32 %v221_v49, %v212_v53  ;;  %v227_v56 = vmul.f32 %v226_v50, %v205_v52  ;;  %v229_v57 = vmul.f32 %v228_v51, %v212_v53 }
  0x65   :  { %v223_v60 = vadd.f32 %v222_v55, %v220_v54  ;;  %v230_v61 = vadd.f32 %v229_v57, %v227_v56 }
  0x67   :  { %v225_v2 = vadd.f32 %v224_v58, %v223_v60  ;;  %v232_v3 = vadd.f32 %v231_v59, %v230_v61 }
  0x69   :  { %v240_v5 = vmul.f32 %v239_v62, %v225_v2  ;;  %v242_v6 = vmul.f32 %v241_v63, %v232_v3  ;;  %v247_v7 = vmul.f32 %v246_v0, %v225_v2  ;;  %v249_v8 = vmul.f32 %v248_v1, %v232_v3 }
  0x6b   :  { %v243_v11 = vadd.f32 %v242_v6, %v240_v5  ;;  %v250_v12 = vadd.f32 %v249_v8, %v247_v7 }
  0x6d   :  { %v245_v13 = vadd.f32 %v244_v9, %v243_v11  ;;  %v252_v14 = vadd.f32 %v251_v10, %v250_v12 }
  0x6f   :  { %257 = vst.msk [vmem:[#allocation9] ss:$2 sm:$0xf] %vm255_vm0, %v245_v13  ;;  %259 = vst.msk [vmem:[#allocation9 + $0x1] ss:$2 sm:$0xf] %vm255_vm0, %v252_v14 }
  0x70   :  { %394 = shalt.err (!%p391_p6)
}
  0x71   :  { %s395_s15 = scalar_lea.hbm %s620_s3, 128 }
  0x72   :  { %p396_p7 = scmp.ne.s32.totalorder %s620_s3, %s395_s15  ;;  %p399_p8 = scmp.lt.u32.totalorder %s395_s15, %s620_s3 }
  0x74   :  { %p401_p9 = pnand %p399_p8, %p396_p7 }
  0x76   :  { %404 = shalt.err (!%p401_p9)
}
  0x77   :  { %269 = dma.vmem_to_hbm [thread:$0]  %s267_s11, 128, %s620_s3, [#allocation4]  }
  0x78   :  { %411 = dma.done.wait [#allocation4], 128  }
  0x79   :  { %412 = vsyncadd [#allocation4], 4294967168 }
  0x7a   :  { %273 = vsyncpa [#allocation3], 1 }
  0x7b   :  { %274 = vsyncpa [#allocation4], 1 }
  0x7c   :  { %275 = vsyncpa [#allocation5], 1 }
  0x7d   :  { %276 = vsyncpa [#allocation6], 1 }

</bundles_post_ra>
